<compile_context>
chip_gen: v6e
topology: v6e:2x2x1
jax: 0.10.0
libtpu: 0.0.40
codegen_flags: <defaults>
</compile_context>

<pallas_src>
import math
import functools

import jax
import jax.numpy as jnp
from jax import lax
from jax.experimental import pallas as pl
from jax.experimental.pallas import tpu as pltpu

_INV_SQRT2 = 1.0 / math.sqrt(2.0)


def _mlp_kernel(x_ref, w1_ref, b1_ref, w2_ref, b2_ref, o_ref, acc_ref):
    # x_ref: (tm, d_model)   w1_ref: (d_model, tf)   b1_ref: (1, tf)
    # w2_ref: (tf, d_model)  b2_ref: (1, d_model)
    # o_ref:  (tm, d_model)  acc_ref: (tm, d_model) f32 scratch
    j = pl.program_id(1)

    @pl.when(j == 0)
    def _init():
        acc_ref[...] = jnp.zeros_like(acc_ref)

    # ff1 chunk: native-dtype operands on the MXU, f32 accumulate.
    h = jnp.dot(x_ref[...], w1_ref[...], preferred_element_type=jnp.float32)
    h = h + b1_ref[...].astype(jnp.float32)

    # Exact erf-GELU (matches torch.nn.GELU default), computed in f32.
    h = 0.5 * h * (1.0 + lax.erf(h * _INV_SQRT2))

    # ff2 partial sum over this d_ff chunk; cast h back to weight dtype so the
    # MXU runs at native (e.g. bf16) rate; accumulator stays f32.
    acc_ref[...] += jnp.dot(h.astype(w2_ref.dtype), w2_ref[...],
                            preferred_element_type=jnp.float32)

    @pl.when(j == pl.num_programs(1) - 1)
    def _finalize():
        y = acc_ref[...] + b2_ref[...].astype(jnp.float32)
        o_ref[...] = y.astype(o_ref.dtype)


def _pick_tile(dim, target, align):
    """Largest multiple of `align` that divides `dim` and is <= target,
    falling back to the full dim (satisfies the (8,128) BlockSpec rule)."""
    if dim <= target or dim % align != 0:
        return dim
    t = (min(target, dim) // align) * align
    while t >= align:
        if dim % t == 0:
            return t
        t -= align
    return dim


def mlp_pallas(x, w1, b1, w2, b2, *, tm=None, tf=None):
    """x: [M, d_model]; w1: [d_model, d_ff]; b1: [d_ff];
       w2: [d_ff, d_model]; b2: [d_model]  ->  [M, d_model]"""
    M, d_model = x.shape
    d_ff = w1.shape[1]

    # Row tile: multiple of 128 (works for v5e 128x128 and v6e/v7x 256x256
    # MXU fill); hidden tile: multiple of 128 lanes, sized for ~48 MiB VMEM
    # so the same spec fits v7x's 64 MiB as well as v5e/v6e's 128 MiB.
    if tm is None:
        tm = _pick_tile(M, 256, 128)
    if tf is None:
        tf = _pick_tile(d_ff, 1024, 128)
    assert M % tm == 0 and d_ff % tf == 0

    b1_2d = b1.reshape(1, d_ff)
    b2_2d = b2.reshape(1, d_model)

    grid = (M // tm, d_ff // tf)
    itemsize = jnp.dtype(x.dtype).itemsize

    # VMEM footprint estimate (double-buffered x/out/W tiles + f32 accumulator).
    vmem_est = (
        2 * tm * d_model * itemsize            # x tiles
        + 2 * tm * d_model * itemsize          # out tiles
        + 2 * d_model * tf * itemsize          # W1 tiles
        + 2 * tf * d_model * itemsize          # W2 tiles
        + 2 * (tf + d_model) * itemsize        # biases
        + tm * d_model * 4                     # accumulator
    )
    cp_kwargs = dict(dimension_semantics=("parallel", "arbitrary"))
    if vmem_est > 24 * 1024 * 1024:
        # Raise the scoped-VMEM ceiling, but never past v7x's 64 MiB physical.
        cp_kwargs["vmem_limit_bytes"] = int(min(vmem_est * 1.25, 64 * 1024 * 1024))

    cost = pl.CostEstimate(
        flops=4 * M * d_model * d_ff,                 # two matmuls
        transcendentals=M * d_ff,                     # erf per hidden element
        bytes_accessed=(2 * M * d_model * itemsize    # x in + y out
                        + (M // tm) * (2 * d_model * d_ff + d_ff + d_model) * itemsize),
    )

    return pl.pallas_call(
        _mlp_kernel,
        out_shape=jax.ShapeDtypeStruct((M, d_model), x.dtype),
        grid_spec=pltpu.PrefetchScalarGridSpec(
            num_scalar_prefetch=0,
            grid=grid,
            in_specs=[
                pl.BlockSpec((tm, d_model), lambda i, j: (i, 0)),    # x row tile
                pl.BlockSpec((d_model, tf), lambda i, j: (0, j)),    # W1 d_ff tile
                pl.BlockSpec((1, tf),       lambda i, j: (0, j)),    # b1 chunk
                pl.BlockSpec((tf, d_model), lambda i, j: (j, 0)),    # W2 d_ff tile
                pl.BlockSpec((1, d_model),  lambda i, j: (0, 0)),    # b2 (constant)
            ],
            out_specs=pl.BlockSpec((tm, d_model), lambda i, j: (i, 0)),
            scratch_shapes=[pltpu.VMEM((tm, d_model), jnp.float32)],
        ),
        compiler_params=pltpu.CompilerParams(**cp_kwargs),
        cost_estimate=cost,
    )(x, w1, b1_2d, w2, b2_2d)


def mlp_forward(x, params, *, tm=None, tf=None):
    """x: [..., d_model] (e.g. [batch, seq, d_model]) -> same shape."""
    w1, b1, w2, b2 = params
    d_model = x.shape[-1]
    lead = x.shape[:-1]
    x2d = x.reshape(-1, d_model)
    y2d = mlp_pallas(x2d, w1, b1, w2, b2, tm=tm, tf=tf)
    return y2d.reshape(*lead, d_model)


def init_params(key, d_model, d_ff, dtype=jnp.float32):
    # Mimics nn.Linear's uniform init deterministically.
    k1, k2, k3, k4 = jax.random.split(key, 4)
    lim1 = 1.0 / math.sqrt(d_model)
    lim2 = 1.0 / math.sqrt(d_ff)
    # Stored pre-transposed relative to PyTorch's (out_features, in_features).
    w1 = jax.random.uniform(k1, (d_model, d_ff), dtype, -lim1, lim1)
    b1 = jax.random.uniform(k2, (d_ff,), dtype, -lim1, lim1)
    w2 = jax.random.uniform(k3, (d_ff, d_model), dtype, -lim2, lim2)
    b2 = jax.random.uniform(k4, (d_model,), dtype, -lim2, lim2)
    return (w1, b1, w2, b2)


if __name__ == "__main__":
    batch, seq, d_model, d_ff = 2, 8, 32, 64
    key = jax.random.PRNGKey(0)
    kx, kp = jax.random.split(key)
    x = jax.random.normal(kx, (batch, seq, d_model), jnp.float32)
    params = init_params(kp, d_model, d_ff)

    y = mlp_forward(x, params)
    y = jax.block_until_ready(y)

    # Reference check in plain JAX (same math: Linear -> erf-GELU -> Linear).
    w1, b1, w2, b2 = params
    h_ref = x @ w1 + b1
    h_ref = 0.5 * h_ref * (1.0 + lax.erf(h_ref / math.sqrt(2.0)))
    y_ref = h_ref @ w2 + b2
    assert y.shape == (batch, seq, d_model)
    assert jnp.allclose(y, y_ref, atol=1e-5, rtol=1e-5)

    print("KERNEL_OK")
</pallas_src>

<mosaic_0001>
module attributes {stable_mosaic.version = 11 : i64} {
  func.func @_mlp_kernel(%arg0: i32, %arg1: i32, %arg2: memref<16x32xf32, #tpu.memory_space<vmem>>, %arg3: memref<32x64xf32, #tpu.memory_space<vmem>>, %arg4: memref<1x64xf32, #tpu.memory_space<vmem>>, %arg5: memref<64x32xf32, #tpu.memory_space<vmem>>, %arg6: memref<1x32xf32, #tpu.memory_space<vmem>>, %arg7: memref<16x32xf32, #tpu.memory_space<vmem>>, %arg8: memref<16x32xf32, #tpu.memory_space<vmem>>) attributes {dimension_semantics = [#tpu.dimension_semantics<parallel>, #tpu.dimension_semantics<arbitrary>], iteration_bounds = array<i64: 1, 1>, scalar_prefetch = 0 : i64, scratch_operands = 1 : i64, tpu.core_type = #tpu.core_type<tc>, window_params = [{transform_indices = @transform_0, window_bounds = array<i64: 16, 32>}, {transform_indices = @transform_1, window_bounds = array<i64: 32, 64>}, {transform_indices = @transform_2, window_bounds = array<i64: 1, 64>}, {transform_indices = @transform_3, window_bounds = array<i64: 64, 32>}, {pipeline_mode = #tpu.pipeline_mode<synchronous>, transform_indices = @transform_4, window_bounds = array<i64: 1, 32>}, {transform_indices = @transform_5, window_bounds = array<i64: 16, 32>}]} {
    %c0_i32 = arith.constant 0 : i32
    %0 = arith.cmpi eq, %arg1, %c0_i32 : i32
    %1 = arith.extui %0 : i1 to i32
    %c0_i32_0 = arith.constant 0 : i32
    %2 = arith.cmpi ne, %1, %c0_i32_0 : i32
    scf.if %2 {
      %cst_18 = arith.constant 0.000000e+00 : f32
      %25 = vector.broadcast %cst_18 : f32 to vector<16x32xf32>
      %c0_19 = arith.constant 0 : index
      %c0_20 = arith.constant 0 : index
      %26 = vector.load %arg8[%c0_19, %c0_20] : memref<16x32xf32, #tpu.memory_space<vmem>>, vector<16x32xf32>
      tpu.vector_store %arg8[%c0_19, %c0_20], %25 {strides = array<i32>} : memref<16x32xf32, #tpu.memory_space<vmem>>, vector<16x32xf32>,
    } else {
    }
    %c0 = arith.constant 0 : index
    %c0_1 = arith.constant 0 : index
    %3 = vector.load %arg2[%c0, %c0_1] : memref<16x32xf32, #tpu.memory_space<vmem>>, vector<16x32xf32>
    %c0_2 = arith.constant 0 : index
    %c0_3 = arith.constant 0 : index
    %4 = vector.load %arg3[%c0_2, %c0_3] : memref<32x64xf32, #tpu.memory_space<vmem>>, vector<32x64xf32>
    %cst = arith.constant dense<0.000000e+00> : vector<16x64xf32>
    %5 = tpu.matmul %3, %4, %cst {dimension_numbers = #tpu.dot_dimension_numbers<[1], [0], [0], [1], [0, 0, 1, 1], [], []>} : vector<16x32xf32>, vector<32x64xf32>, vector<16x64xf32> -> vector<16x64xf32>
    %c0_4 = arith.constant 0 : index
    %c0_5 = arith.constant 0 : index
    %6 = vector.load %arg4[%c0_4, %c0_5] : memref<1x64xf32, #tpu.memory_space<vmem>>, vector<1x64xf32>
    %7 = vector.broadcast %6 : vector<1x64xf32> to vector<16x64xf32>
    %8 = arith.addf %5, %7 : vector<16x64xf32>
    %cst_6 = arith.constant 5.000000e-01 : f32
    %9 = vector.broadcast %cst_6 : f32 to vector<16x64xf32>
    %10 = arith.mulf %9, %8 : vector<16x64xf32>
    %cst_7 = arith.constant 0.707106769 : f32
    %11 = vector.broadcast %cst_7 : f32 to vector<16x64xf32>
    %12 = arith.mulf %8, %11 : vector<16x64xf32>
    %13 = math.erf %12 : vector<16x64xf32>
    %cst_8 = arith.constant 1.000000e+00 : f32
    %14 = vector.broadcast %cst_8 : f32 to vector<16x64xf32>
    %15 = arith.addf %14, %13 : vector<16x64xf32>
    %16 = arith.mulf %10, %15 : vector<16x64xf32>
    %c0_9 = arith.constant 0 : index
    %c0_10 = arith.constant 0 : index
    %17 = vector.load %arg8[%c0_9, %c0_10] : memref<16x32xf32, #tpu.memory_space<vmem>>, vector<16x32xf32>
    %c0_11 = arith.constant 0 : index
    %c0_12 = arith.constant 0 : index
    %18 = vector.load %arg5[%c0_11, %c0_12] : memref<64x32xf32, #tpu.memory_space<vmem>>, vector<64x32xf32>
    %cst_13 = arith.constant dense<0.000000e+00> : vector<16x32xf32>
    %19 = tpu.matmul %16, %18, %cst_13 {dimension_numbers = #tpu.dot_dimension_numbers<[1], [0], [0], [1], [0, 0, 1, 1], [], []>} : vector<16x64xf32>, vector<64x32xf32>, vector<16x32xf32> -> vector<16x32xf32>
    %20 = arith.addf %17, %19 : vector<16x32xf32>
    %c0_14 = arith.constant 0 : index
    %c0_15 = arith.constant 0 : index
    %21 = vector.load %arg8[%c0_14, %c0_15] : memref<16x32xf32, #tpu.memory_space<vmem>>, vector<16x32xf32>
    tpu.vector_store %arg8[%c0_14, %c0_15], %20 {strides = array<i32>} : memref<16x32xf32, #tpu.memory_space<vmem>>, vector<16x32xf32>,
    %c0_i32_16 = arith.constant 0 : i32
    %22 = arith.cmpi eq, %arg1, %c0_i32_16 : i32
    %23 = arith.extui %22 : i1 to i32
    %c0_i32_17 = arith.constant 0 : i32
    %24 = arith.cmpi ne, %23, %c0_i32_17 : i32
    scf.if %24 {
      %c0_18 = arith.constant 0 : index
      %c0_19 = arith.constant 0 : index
      %25 = vector.load %arg8[%c0_18, %c0_19] : memref<16x32xf32, #tpu.memory_space<vmem>>, vector<16x32xf32>
      %c0_20 = arith.constant 0 : index
      %c0_21 = arith.constant 0 : index
      %26 = vector.load %arg6[%c0_20, %c0_21] : memref<1x32xf32, #tpu.memory_space<vmem>>, vector<1x32xf32>
      %27 = vector.broadcast %26 : vector<1x32xf32> to vector<16x32xf32>
      %28 = arith.addf %25, %27 : vector<16x32xf32>
      %c0_22 = arith.constant 0 : index
      %c0_23 = arith.constant 0 : index
      %29 = vector.load %arg7[%c0_22, %c0_23] : memref<16x32xf32, #tpu.memory_space<vmem>>, vector<16x32xf32>
      tpu.vector_store %arg7[%c0_22, %c0_23], %28 {strides = array<i32>} : memref<16x32xf32, #tpu.memory_space<vmem>>, vector<16x32xf32>,
    } else {
    }
    return
  }
  func.func @transform_0(%arg0: i32, %arg1: i32) -> (i32, i32) {
    %c0_i32 = arith.constant 0 : i32
    %c0_i32_0 = arith.constant 0 : i32
    return %arg0, %c0_i32 : i32, i32
  }
  func.func @transform_1(%arg0: i32, %arg1: i32) -> (i32, i32) {
    %c0_i32 = arith.constant 0 : i32
    %c0_i32_0 = arith.constant 0 : i32
    return %c0_i32, %arg1 : i32, i32
  }
  func.func @transform_2(%arg0: i32, %arg1: i32) -> (i32, i32) {
    %c0_i32 = arith.constant 0 : i32
    %c0_i32_0 = arith.constant 0 : i32
    return %c0_i32, %arg1 : i32, i32
  }
  func.func @transform_3(%arg0: i32, %arg1: i32) -> (i32, i32) {
    %c0_i32 = arith.constant 0 : i32
    %c0_i32_0 = arith.constant 0 : i32
    return %arg1, %c0_i32 : i32, i32
  }
  func.func @transform_4(%arg0: i32, %arg1: i32) -> (i32, i32) {
    %c0_i32 = arith.constant 0 : i32
    %c0_i32_0 = arith.constant 0 : i32
    %c0_i32_1 = arith.constant 0 : i32
    return %c0_i32, %c0_i32_0 : i32, i32
  }
  func.func @transform_5(%arg0: i32, %arg1: i32) -> (i32, i32) {
    %c0_i32 = arith.constant 0 : i32
    %c0_i32_0 = arith.constant 0 : i32
    return %arg0, %c0_i32 : i32, i32
  }
}

</mosaic_0001>

<bundles_post_ra>
// kernel: tpu_custom_call.1
= control target key start
LH: loop header
LB: loop body
LE: loop exit
PB: predicated region body
PF: predicated region fallthrough
CT: control target
= control target key end

     0   :  { %vm25_vm0 = vcmask 261120   ;;  %s436_s0 = inlined_call_operand.vmem [shape: f32[16,32], index: 0, kind: input, shape index: {}]   ;;  %s437_s1 = inlined_call_operand.vmem [shape: f32[32,64], index: 1, kind: input, shape index: {}]   ;;  %s438_s2 = inlined_call_operand.vmem [shape: f32[1,64], index: 2, kind: input, shape index: {}]   ;;  %s439_s3 = inlined_call_operand.vmem [shape: f32[64,32], index: 3, kind: input, shape index: {}]   ;;  %s440_s4 = inlined_call_operand.vmem [shape: f32[1,32], index: 4, kind: input, shape index: {}]   ;;  %s441_s5 = inlined_call_operand.hbm [shape: f32[16,32], index: 5, kind: output, shape index: {}]  }
   0x1   :  { %v33_v0 = vld [vmem:[%s437_s1 + $0x18] sm:$0xff]  ;;  %v32_v1 = vld [vmem:[%s437_s1 + $0x10] sm:$0xff]  ;;  %v28_v2 = vld [vmem:[%s436_s0] sm:$0xff] }
   0x2   :  { %283 = vmatprep.subr.mxu0 %v33_v0  ;;  %v31_v3 = vld [vmem:[%s437_s1 + $0x8] sm:$0xff]  ;;  %291 = vmatprep.mubr.msk.f32.mxu0 %vm25_vm0, %v28_v2 }
   0x3   :  { %284 = vmatpush3.msra.mxu0 %v33_v0 }
   0x4   :  { %10 = vsyncpa [#allocation4], 0  ;;  %285 = vmatprep.subr.mxu0 %v32_v1  ;;  %v30_v4 = vld [vmem:[%s437_s1] sm:$0xff]  ;;  %v29_v5 = vld [vmem:[%s436_s0 + $0x8] sm:$0xff]  ;;  %v343_v14 = vmov 0.0   ;;  %vm143_vm1 = vcmask 523264  }
   0x5   :  { %286 = vmatpush3.msra.mxu0 %v32_v1  ;;  %v142_v6 = vld [vmem:[%s439_s3 + $0x38] sm:$0xff]  ;;  %v141_v7 = vld [vmem:[%s439_s3 + $0x30] sm:$0xff]  ;;  %v140_v8 = vld [vmem:[%s439_s3 + $0x28] sm:$0xff]  ;;  %27 = vst.msk [vmem:[#allocation2 + $0x8] sm:$0xff] %vm25_vm0, %v343_v14  ;;  %s344_s21 = smov [#allocation3]  }
   0x6   :  { %287 = vmatprep.subr.mxu0 %v31_v3  ;;  %294 = vmatprep.subr.mxu1 %v142_v6  ;;  %v139_v9 = vld [vmem:[%s439_s3 + $0x20] sm:$0xff]  ;;  %v138_v10 = vld [vmem:[%s439_s3 + $0x18] sm:$0xff]  ;;  %v137_v11 = vld [vmem:[%s439_s3 + $0x10] sm:$0xff]  ;;  %26 = vst.msk [vmem:[#allocation2] sm:$0xff] %vm25_vm0, %v343_v14  ;;  %s250_s22 = sshll.u32 %s344_s21, 4  ;;  %s251_s22 = int_to_ptr.vmem [resolvable:$true] %s250_s22 }
   0x7   :  { %288 = vmatpush3.msra.mxu0 %v31_v3  ;;  %295 = vmatpush3.msra.mxu1 %v142_v6  ;;  %v136_v12 = vld [vmem:[%s439_s3 + $0x8] sm:$0xff]  ;;  %v135_v13 = vld [vmem:[%s439_s3] sm:$0xff]  ;;  %s321_s23 = scalar_lea.vmem %s251_s22, 256  ;;  %p326_p1 = scmp.lt.s32.totalorder %s251_s22, %s251_s22 }
   0x8   :  { %289 = vmatprep.subr.mxu0 %v30_v4  ;;  %296 = vmatprep.subr.mxu1 %v141_v7  ;;  %v261_v15 = vld [vmem:[%s438_s2] ss:$0 sm:$0xff]  ;;  %p322_p0 = scmp.ne.s32.totalorder %s251_s22, %s321_s23  ;;  %p327_p2 = scmp.lt.s32.totalorder %s321_s23, %s321_s23 }
   0x9   :  { %290 = vmatpush3.msra.mxu0 %v30_v4  ;;  %297 = vmatpush3.msra.mxu1 %v141_v7  ;;  %v266_v36 = vld [vmem:[%s440_s4] ss:$0 sm:$0xff] }
   0xa   :  { %292 = vmatmul.mubr.msk.f32.vlgmr.msra.gmra.mxu0 %vm25_vm0, %v29_v5  ;;  %298 = vmatprep.subr.mxu1 %v140_v8  ;;  %p328_p3 = por %p327_p2, %p326_p1 }
   0xb   :  { %299 = vmatpush3.msra.mxu1 %v140_v8 }
   0xc   :  { %300 = vmatprep.subr.mxu1 %v139_v9  ;;  %v134_v30 = vld [vmem:[#allocation2 + $0x8] sm:$0xff]  ;;  %p329_p4 = pnand %p328_p3, %p322_p0 }
   0xd   :  { %301 = vmatpush3.msra.mxu1 %v139_v9  ;;  %v133_v32 = vld [vmem:[#allocation2] sm:$0xff] }
   0xe   :  { %302 = vmatprep.subr.mxu1 %v138_v10 }
   0xf   :  { %303 = vmatpush3.msra.mxu1 %v138_v10 }
  0x10   :  { %304 = vmatprep.subr.mxu1 %v137_v11 }
  0x11   :  { %305 = vmatpush3.msra.mxu1 %v137_v11 }
  0x12   :  { %306 = vmatprep.subr.mxu1 %v136_v12 }
  0x13   :  { %307 = vmatpush3.msra.mxu1 %v136_v12 }
  0x14   :  { %308 = vmatprep.subr.mxu1 %v135_v13 }
  0x15   :  { %309 = vmatpush3.msra.mxu1 %v135_v13 }
  0xca   :  { %v293_v16 = vpop.f32.mrf.mxu0 }
  0xcb   :  { %v120_v17 = vadd.f32 %v293_v16, %v261_v15 }
  0xcc   :  { %v114_v18 = vpop.f32.mrf.mxu0 }
  0xcd   :  { %v126_v19 = vmul.f32 0.70710677, %v120_v17  ;;  %v115_v20 = vadd.f32 %v261_v15, %v114_v18  ;;  %v124_v27 = vmul.f32 0.5, %v120_v17 }
  0xcf   :  { %317 = verf.f32 %v126_v19  ;;  %v125_v21 = vmul.f32 0.70710677, %v115_v20  ;;  %v123_v25 = vmul.f32 0.5, %v115_v20 }
  0xd1   :  { %319 = verf.f32 %v125_v21 }
  0xdc   :  { %v318_v22 = vpop.eup %317 }
  0xdd   :  { %v130_v24 = vadd.f32 1.0, %v318_v22 }
  0xde   :  { %v320_v23 = vpop.eup %319 }
  0xdf   :  { %v129_v26 = vadd.f32 1.0, %v320_v23  ;;  %v132_v29 = vmul.f32 %v130_v24, %v124_v27 }
  0xe1   :  { %v131_v28 = vmul.f32 %v129_v26, %v123_v25 }
  0xe3   :  { %310 = vmatprep.mubr.msk.f32.mxu1 %vm143_vm1, %v131_v28 }
  0xe4   :  { %311 = vmatmul.mubr.msk.f32.vlgmr.msra.gmra.mxu1 %vm143_vm1, %v132_v29 }
 0x1a4   :  { %v312_v31 = vpop.f32.mrf.mxu1 }
 0x1a5   :  { %v226_v33 = vadd.f32 %v312_v31, %v134_v30 }
 0x1a6   :  { %v216_v34 = vpop.f32.mrf.mxu1 }
 0x1a7   :  { %228 = vst.msk [vmem:[#allocation2 + $0x8] sm:$0xff] %vm25_vm0, %v226_v33  ;;  %v225_v35 = vadd.f32 %v216_v34, %v133_v32 }
 0x1a9   :  { %227 = vst.msk [vmem:[#allocation2] sm:$0xff] %vm25_vm0, %v225_v35 }
 0x1ae   :  { %v233_v37 = vld [vmem:[#allocation2 + $0x8] sm:$0xff] }
 0x1af   :  { %v242_v38 = vadd.f32 %v266_v36, %v233_v37 }
 0x1b0   :  { %v232_v39 = vld [vmem:[#allocation2] sm:$0xff] }
 0x1b1   :  { %v241_v40 = vadd.f32 %v266_v36, %v232_v39  ;;  %244 = vst.msk [vmem:[#allocation3 + $0x8] sm:$0xff] %vm25_vm0, %v242_v38 }
 0x1b3   :  { %243 = vst.msk [vmem:[#allocation3] sm:$0xff] %vm25_vm0, %v241_v40 }
 0x1b4   :  { %332 = shalt.err (!%p329_p4)
}
 0x1b5   :  { %s345_s24 = smov 128   ;;  %s346_s4 = smov 8  }
 0x1b6   :  { %256 = dma.vmem_to_hbm [thread:$0]  %s251_s22, 256, %s441_s5, [#allocation4], %s345_s24, %s345_s24, %s346_s4  }
 0x1b7   :  { %341 = dma.done.wait [#allocation4], 256  }
 0x1b8   :  { %342 = vsyncadd [#allocation4], 4294967040 }
 0x1b9   :  { %260 = vsyncpa [#allocation4], 1 }

</bundles_post_ra>
